<compile_context>
chip_gen: v7x
topology: tpu7x:2x2x1
jax: 0.10.0
libtpu: 0.0.40
codegen_flags: <defaults>
</compile_context>

<pallas_src>
import jax
import jax.numpy as jnp
from jax.experimental import pallas as pl
from jax.experimental.pallas import tpu as pltpu


def rou_kernel(x_ref, w_ref, b_ref, o_ref, acc_ref):
    # x_ref:   (tm, tk)  X tile
    # w_ref:   (tk, tn)  W^T tile (contraction on sublanes, out-features on lanes)
    # b_ref:   (1, tn)   bias tile
    # o_ref:   (tm, tn)  output tile (resident across the K grid axis)
    # acc_ref: (tm, tn)  f32 accumulator scratch
    k = pl.program_id(2)

    @pl.when(k == 0)
    def _init():
        acc_ref[...] = jnp.zeros_like(acc_ref)

    acc_ref[...] += jnp.dot(x_ref[...], w_ref[...],
                            preferred_element_type=jnp.float32)

    @pl.when(k == pl.num_programs(2) - 1)
    def _finalize():
        # Fused epilogue: bias add (VPU) + tanh (EUP) + single lane-dense store.
        o_ref[...] = jnp.tanh(acc_ref[...] + b_ref[...]).astype(o_ref.dtype)


def _round_up(x, m):
    return ((x + m - 1) // m) * m


def rou_forward(X, W, b, *, tm=None, tn=None, tk=None):
    """Pallas equivalent of Rou(ln, s).forward(X) = tanh(X @ W.T + b).

    X: (..., K) float32, W: (N, K) (torch nn.Linear layout), b: (N,) float32.
    """
    X = jnp.asarray(X, jnp.float32)
    W = jnp.asarray(W, jnp.float32)
    b = jnp.asarray(b, jnp.float32)

    lead_shape = X.shape[:-1]
    K = X.shape[-1]
    N = W.shape[0]
    X2 = X.reshape(-1, K)          # flatten leading dims like nn.Linear
    M = X2.shape[0]

    # MXU / lane-aligned tile sizes.
    if tm is None:
        tm = min(256, _round_up(M, 8))      # sublane-aligned (f32)
    if tn is None:
        tn = min(256, _round_up(N, 128))    # lane-dense output stores
    if tk is None:
        tk = min(512, _round_up(K, 128))    # full MXU contraction rows

    Mp, Kp, Np = _round_up(M, tm), _round_up(K, tk), _round_up(N, tn)

    Xp = jnp.pad(X2, ((0, Mp - M), (0, Kp - K)))
    Wt = jnp.pad(W.T, ((0, Kp - K), (0, Np - N)))          # (Kp, Np)
    bp = jnp.pad(b, (0, Np - N)).reshape(1, Np)            # (1, Np)

    grid = (Mp // tm, Np // tn, Kp // tk)

    # Explicit VMEM budget: double-buffered input tiles + output tile +
    # accumulator scratch, with 1.5x headroom; clamped to a range valid on
    # v5e / v6e / v7x scoped-VMEM limits.
    need = 4 * (2 * (tm * tk + tk * tn + tn) + 2 * tm * tn + tm * tn)
    vmem_bytes = int(min(max(1.5 * need, 16 << 20), 32 << 20))

    out_p = pl.pallas_call(
        rou_kernel,
        out_shape=jax.ShapeDtypeStruct((Mp, Np), jnp.float32),
        grid_spec=pltpu.PrefetchScalarGridSpec(
            num_scalar_prefetch=0,
            grid=grid,
            in_specs=[
                pl.BlockSpec((tm, tk), lambda i, j, k: (i, k)),  # X tile
                pl.BlockSpec((tk, tn), lambda i, j, k: (k, j)),  # W^T tile
                pl.BlockSpec((1, tn), lambda i, j, k: (0, j)),   # bias tile
            ],
            out_specs=pl.BlockSpec((tm, tn), lambda i, j, k: (i, j)),
            scratch_shapes=[pltpu.VMEM((tm, tn), jnp.float32)],
        ),
        compiler_params=pltpu.CompilerParams(
            dimension_semantics=("parallel", "parallel", "arbitrary"),
            vmem_limit_bytes=vmem_bytes,
        ),
    )(Xp, Wt, bp)

    out = out_p[:M, :N]
    return out.reshape(*lead_shape, N)


if __name__ == "__main__":
    key = jax.random.PRNGKey(0)
    k_x, k_w, k_b = jax.random.split(key, 3)

    # Small shapes consistent with the module: Rou(ln=32, s=16) on a batch of 8 rows.
    ln = 32   # in_features
    s = 16    # out_features
    B = 8     # batch

    X = jax.random.normal(k_x, (B, ln), dtype=jnp.float32)
    W = jax.random.normal(k_w, (s, ln), dtype=jnp.float32) * (1.0 / jnp.sqrt(ln))
    b = jax.random.normal(k_b, (s,), dtype=jnp.float32) * 0.1

    out = rou_forward(X, W, b)
    out = jax.block_until_ready(out)

    # Reference check (pure JAX, mirrors the torch module exactly).
    ref = jnp.tanh(X @ W.T + b)
    assert out.shape == (B, s)
    assert jnp.allclose(out, ref, atol=1e-5, rtol=1e-5), "mismatch vs reference"

    print("KERNEL_OK")
</pallas_src>

<mosaic_0001>
module attributes {stable_mosaic.version = 11 : i64} {
  func.func @rou_kernel(%arg0: i32, %arg1: i32, %arg2: i32, %arg3: memref<8x128xf32, #tpu.memory_space<vmem>>, %arg4: memref<128x128xf32, #tpu.memory_space<vmem>>, %arg5: memref<1x128xf32, #tpu.memory_space<vmem>>, %arg6: memref<8x128xf32, #tpu.memory_space<vmem>>, %arg7: memref<8x128xf32, #tpu.memory_space<vmem>>) attributes {dimension_semantics = [#tpu.dimension_semantics<parallel>, #tpu.dimension_semantics<parallel>, #tpu.dimension_semantics<arbitrary>], iteration_bounds = array<i64: 1, 1, 1>, scalar_prefetch = 0 : i64, scratch_operands = 1 : i64, tpu.core_type = #tpu.core_type<tc>, window_params = [{transform_indices = @transform_0, window_bounds = array<i64: 8, 128>}, {transform_indices = @transform_1, window_bounds = array<i64: 128, 128>}, {transform_indices = @transform_2, window_bounds = array<i64: 1, 128>}, {transform_indices = @transform_3, window_bounds = array<i64: 8, 128>}]} {
    %c0_i32 = arith.constant 0 : i32
    %0 = arith.cmpi eq, %arg2, %c0_i32 : i32
    %1 = arith.extui %0 : i1 to i32
    %c0_i32_0 = arith.constant 0 : i32
    %2 = arith.cmpi ne, %1, %c0_i32_0 : i32
    scf.if %2 {
      %cst_10 = arith.constant 0.000000e+00 : f32
      %12 = vector.broadcast %cst_10 : f32 to vector<8x128xf32>
      %c0_11 = arith.constant 0 : index
      %c0_12 = arith.constant 0 : index
      %13 = vector.load %arg7[%c0_11, %c0_12] : memref<8x128xf32, #tpu.memory_space<vmem>>, vector<8x128xf32>
      tpu.vector_store %arg7[%c0_11, %c0_12], %12 {strides = array<i32>} : memref<8x128xf32, #tpu.memory_space<vmem>>, vector<8x128xf32>,
    } else {
    }
    %c0 = arith.constant 0 : index
    %c0_1 = arith.constant 0 : index
    %3 = vector.load %arg7[%c0, %c0_1] : memref<8x128xf32, #tpu.memory_space<vmem>>, vector<8x128xf32>
    %c0_2 = arith.constant 0 : index
    %c0_3 = arith.constant 0 : index
    %4 = vector.load %arg3[%c0_2, %c0_3] : memref<8x128xf32, #tpu.memory_space<vmem>>, vector<8x128xf32>
    %c0_4 = arith.constant 0 : index
    %c0_5 = arith.constant 0 : index
    %5 = vector.load %arg4[%c0_4, %c0_5] : memref<128x128xf32, #tpu.memory_space<vmem>>, vector<128x128xf32>
    %cst = arith.constant dense<0.000000e+00> : vector<8x128xf32>
    %6 = tpu.matmul %4, %5, %cst {dimension_numbers = #tpu.dot_dimension_numbers<[1], [0], [0], [1], [0, 0, 1, 1], [], []>} : vector<8x128xf32>, vector<128x128xf32>, vector<8x128xf32> -> vector<8x128xf32>
    %7 = arith.addf %3, %6 : vector<8x128xf32>
    %c0_6 = arith.constant 0 : index
    %c0_7 = arith.constant 0 : index
    %8 = vector.load %arg7[%c0_6, %c0_7] : memref<8x128xf32, #tpu.memory_space<vmem>>, vector<8x128xf32>
    tpu.vector_store %arg7[%c0_6, %c0_7], %7 {strides = array<i32>} : memref<8x128xf32, #tpu.memory_space<vmem>>, vector<8x128xf32>,
    %c0_i32_8 = arith.constant 0 : i32
    %9 = arith.cmpi eq, %arg2, %c0_i32_8 : i32
    %10 = arith.extui %9 : i1 to i32
    %c0_i32_9 = arith.constant 0 : i32
    %11 = arith.cmpi ne, %10, %c0_i32_9 : i32
    scf.if %11 {
      %c0_10 = arith.constant 0 : index
      %c0_11 = arith.constant 0 : index
      %12 = vector.load %arg7[%c0_10, %c0_11] : memref<8x128xf32, #tpu.memory_space<vmem>>, vector<8x128xf32>
      %c0_12 = arith.constant 0 : index
      %c0_13 = arith.constant 0 : index
      %13 = vector.load %arg5[%c0_12, %c0_13] : memref<1x128xf32, #tpu.memory_space<vmem>>, vector<1x128xf32>
      %14 = vector.broadcast %13 : vector<1x128xf32> to vector<8x128xf32>
      %15 = arith.addf %12, %14 : vector<8x128xf32>
      %16 = math.tanh %15 : vector<8x128xf32>
      %c0_14 = arith.constant 0 : index
      %c0_15 = arith.constant 0 : index
      %17 = vector.load %arg6[%c0_14, %c0_15] : memref<8x128xf32, #tpu.memory_space<vmem>>, vector<8x128xf32>
      tpu.vector_store %arg6[%c0_14, %c0_15], %16 {strides = array<i32>} : memref<8x128xf32, #tpu.memory_space<vmem>>, vector<8x128xf32>,
    } else {
    }
    return
  }
  func.func @transform_0(%arg0: i32, %arg1: i32, %arg2: i32) -> (i32, i32) {
    %c0_i32 = arith.constant 0 : i32
    return %arg0, %arg2 : i32, i32
  }
  func.func @transform_1(%arg0: i32, %arg1: i32, %arg2: i32) -> (i32, i32) {
    %c0_i32 = arith.constant 0 : i32
    return %arg2, %arg1 : i32, i32
  }
  func.func @transform_2(%arg0: i32, %arg1: i32, %arg2: i32) -> (i32, i32) {
    %c0_i32 = arith.constant 0 : i32
    %c0_i32_0 = arith.constant 0 : i32
    return %c0_i32, %arg1 : i32, i32
  }
  func.func @transform_3(%arg0: i32, %arg1: i32, %arg2: i32) -> (i32, i32) {
    %c0_i32 = arith.constant 0 : i32
    return %arg0, %arg1 : i32, i32
  }
}

</mosaic_0001>

<bundles_post_ra>
// kernel: tpu_custom_call.1
= control target key start
LH: loop header
LB: loop body
LE: loop exit
PB: predicated region body
PF: predicated region fallthrough
CT: control target
= control target key end

     0   :  { %8 = vsyncpa [#allocation4], 0  ;;  %s399_s0 = inlined_call_operand.hbm [shape: f32[8,128], index: 0, kind: input, shape index: {}]   ;;  %s400_s1 = inlined_call_operand.hbm [shape: f32[128,128], index: 1, kind: input, shape index: {}]   ;;  %s401_s2 = inlined_call_operand.vmem [shape: f32[1,128], index: 2, kind: input, shape index: {}]   ;;  %s402_s3 = inlined_call_operand.hbm [shape: f32[8,128], index: 3, kind: output, shape index: {}]  }
   0x1   :  { %9 = vsyncpa [#allocation7], 0 }
   0x2   :  { %10 = vsyncpa [#allocation5], 0  ;;  %s325_s12 = smov [#allocation3]   ;;  %s326_s14 = smov [#allocation6]  }
   0x3   :  { %s17_s13 = sshll.u32 %s325_s12, 4  ;;  %s26_s15 = sshll.u32 %s326_s14, 4  ;;  %s18_s13 = int_to_ptr.vmem [resolvable:$true] %s17_s13  ;;  %s353_s15 = int_to_ptr.vmem [resolvable:$true] %s26_s15 }
   0x4   :  { %s253_s18 = scalar_lea.hbm %s399_s0, 128 }
   0x5   :  { %p254_p0 = scmp.ne.s32.totalorder %s399_s0, %s253_s18  ;;  %p257_p1 = scmp.lt.u32.totalorder %s253_s18, %s399_s0 }
   0x7   :  { %p259_p2 = pnand %p257_p1, %p254_p0 }
   0x9   :  { %262 = shalt.err (!%p259_p2)
}
   0xa   :  { %s263_s23 = scalar_lea.vmem %s18_s13, 128  ;;  %p268_p4 = scmp.lt.s32.totalorder %s18_s13, %s18_s13 }
   0xb   :  { %p264_p3 = scmp.ne.s32.totalorder %s18_s13, %s263_s23  ;;  %p269_p5 = scmp.lt.s32.totalorder %s263_s23, %s263_s23 }
   0xd   :  { %p270_p6 = por %p269_p5, %p268_p4 }
   0xf   :  { %p271_p7 = pnand %p270_p6, %p264_p3 }
  0x11   :  { %274 = shalt.err (!%p271_p7)
}
  0x12   :  { %20 = dma.hbm_to_vmem [thread:$0]  %s399_s0, 128, %s18_s13, [#allocation4]  }
  0x13   :  { %s275_s28 = scalar_lea.hbm %s400_s1, 2048 }
  0x14   :  { %p276_p8 = scmp.ne.s32.totalorder %s400_s1, %s275_s28  ;;  %p279_p9 = scmp.lt.u32.totalorder %s275_s28, %s400_s1 }
  0x16   :  { %p281_p10 = pnand %p279_p9, %p276_p8 }
  0x18   :  { %284 = shalt.err (!%p281_p10)
}
  0x19   :  { %s285_s6 = scalar_lea.vmem %s353_s15, 2048  ;;  %p290_p12 = scmp.lt.s32.totalorder %s353_s15, %s353_s15 }
  0x1a   :  { %p286_p11 = scmp.ne.s32.totalorder %s353_s15, %s285_s6  ;;  %p291_p13 = scmp.lt.s32.totalorder %s285_s6, %s285_s6 }
  0x1c   :  { %p292_p0 = por %p291_p13, %p290_p12 }
  0x1e   :  { %p293_p1 = pnand %p292_p0, %p286_p11 }
  0x20   :  { %296 = shalt.err (!%p293_p1)
}
  0x21   :  { %s327_s0 = smov 128   ;;  %s328_s7 = smov 8  }
  0x22   :  { %32 = dma.hbm_to_vmem [thread:$0]  %s400_s1, 2048, %s353_s15, [#allocation7], %s327_s0, %s327_s0, %s328_s7  }
  0x23   :  { %319 = dma.done.wait [#allocation4], 128  }
  0x24   :  { %320 = vsyncadd [#allocation4], 4294967168 }
  0x25   :  { %321 = dma.done.wait [#allocation7], 2048  }
  0x26   :  { %322 = vsyncadd [#allocation7], 4294965248  ;;  %v329_v0 = vmov 0.0|0.0   ;;  %vm330_vm0 = vmmov 0   ;;  %v331_v1 = vmov 0.0   ;;  %v48_v2 = vld [vmem:[#allocation6] sm:$0xff] }
  0x27   :  { %219 = vmatprep.subr.bf16.mxu0 %v329_v0  ;;  %216 = vmatprep.mubr.msk.f32.mxu0 %vm330_vm0, %v331_v1  ;;  %v49_v3 = vld [vmem:[#allocation6 + $0x8] sm:$0xff]  ;;  %v50_v4 = vld [vmem:[#allocation6 + $0x10] sm:$0xff]  ;;  %v51_v6 = vld [vmem:[#allocation6 + $0x18] sm:$0xff]  ;;  %s332_s11 = smov [#allocation8]  }
  0x28   :  { %v220_v5 = vpack.c.bf16 %v49_v3, %v48_v2  ;;  %v223_v7 = vpack.c.bf16 %v51_v6, %v50_v4  ;;  %v52_v8 = vld [vmem:[#allocation6 + $0x20] sm:$0xff]  ;;  %v53_v9 = vld [vmem:[#allocation6 + $0x28] sm:$0xff]  ;;  %v54_v11 = vld [vmem:[#allocation6 + $0x30] sm:$0xff]  ;;  %s156_s12 = sshll.u32 %s332_s11, 4  ;;  %s157_s12 = int_to_ptr.vmem [resolvable:$true] %s156_s12 }
  0x29   :  { %v226_v10 = vpack.c.bf16 %v53_v9, %v52_v8  ;;  %v55_v12 = vld [vmem:[#allocation6 + $0x38] sm:$0xff]  ;;  %v56_v14 = vld [vmem:[#allocation6 + $0x40] sm:$0xff]  ;;  %v57_v15 = vld [vmem:[#allocation6 + $0x48] sm:$0xff]  ;;  %s297_s13 = scalar_lea.vmem %s157_s12, 128  ;;  %p302_p3 = scmp.lt.s32.totalorder %s157_s12, %s157_s12 }
  0x2a   :  { %221 = vmatpush3.bf16.msra.mxu0 %v220_v5  ;;  %v229_v13 = vpack.c.bf16 %v55_v12, %v54_v11  ;;  %v232_v16 = vpack.c.bf16 %v57_v15, %v56_v14  ;;  %v58_v17 = vld [vmem:[#allocation6 + $0x50] sm:$0xff]  ;;  %v59_v18 = vld [vmem:[#allocation6 + $0x58] sm:$0xff]  ;;  %v60_v20 = vld [vmem:[#allocation6 + $0x60] sm:$0xff]  ;;  %p298_p2 = scmp.ne.s32.totalorder %s157_s12, %s297_s13  ;;  %p303_p4 = scmp.lt.s32.totalorder %s297_s13, %s297_s13 }
  0x2b   :  { %222 = vmatprep.subr.bf16.mxu0 %v329_v0  ;;  %v235_v19 = vpack.c.bf16 %v59_v18, %v58_v17  ;;  %v61_v21 = vld [vmem:[#allocation6 + $0x68] sm:$0xff]  ;;  %v62_v23 = vld [vmem:[#allocation6 + $0x70] sm:$0xff]  ;;  %v63_v24 = vld [vmem:[#allocation6 + $0x78] sm:$0xff] }
  0x2c   :  { %v238_v22 = vpack.c.bf16 %v61_v21, %v60_v20  ;;  %v241_v25 = vpack.c.bf16 %v63_v24, %v62_v23  ;;  %v47_v26 = vld [vmem:[#allocation3] sm:$0xff]  ;;  %p304_p5 = por %p303_p4, %p302_p3 }
  0x2d   :  { %v166_v27 = vld [vmem:[%s401_s2] ss:$0 sm:$0xff] }
  0x2e   :  { %224 = vmatpush3.bf16.msra.mxu0 %v223_v7  ;;  %p305_p6 = pnand %p304_p5, %p298_p2 }
  0x2f   :  { %225 = vmatprep.subr.bf16.mxu0 %v329_v0 }
  0x32   :  { %227 = vmatpush3.bf16.msra.mxu0 %v226_v10 }
  0x33   :  { %228 = vmatprep.subr.bf16.mxu0 %v329_v0 }
  0x36   :  { %230 = vmatpush3.bf16.msra.mxu0 %v229_v13 }
  0x37   :  { %231 = vmatprep.subr.bf16.mxu0 %v329_v0 }
  0x3a   :  { %233 = vmatpush3.bf16.msra.mxu0 %v232_v16 }
  0x3b   :  { %234 = vmatprep.subr.bf16.mxu0 %v329_v0 }
  0x3e   :  { %236 = vmatpush3.bf16.msra.mxu0 %v235_v19 }
  0x3f   :  { %237 = vmatprep.subr.bf16.mxu0 %v329_v0 }
  0x42   :  { %239 = vmatpush3.bf16.msra.mxu0 %v238_v22 }
  0x43   :  { %240 = vmatprep.subr.bf16.mxu0 %v329_v0 }
  0x46   :  { %242 = vmatpush3.bf16.msra.mxu0 %v241_v25 }
  0x49   :  { %217 = vmatmul.mubr.f32.vlgmr.msra.gmra.mrb[0].mxu0 %v47_v26 }
 0x11c   :  { %v130_v28 = vpop.f32.mrb[0].mxu0 }
 0x11d   :  { %v147_v29 = vadd.f32 %v166_v27, %v130_v28  ;;  %v218_v30 = vpop.f32.mrb[1].mxu0 }
 0x11f   :  { %251 = vtanh.f32 %v147_v29 }
 0x129   :  { %v252_v31 = vpop.eup %251 }
 0x12a   :  { %149 = vst [vmem:[#allocation8] sm:$0xff] %v252_v31 }
 0x12b   :  { %308 = shalt.err (!%p305_p6)
}
 0x12c   :  { %s309_s2 = scalar_lea.hbm %s402_s3, 128 }
 0x12d   :  { %p310_p7 = scmp.ne.s32.totalorder %s402_s3, %s309_s2  ;;  %p313_p8 = scmp.lt.u32.totalorder %s309_s2, %s402_s3 }
 0x12f   :  { %p315_p9 = pnand %p313_p8, %p310_p7 }
 0x131   :  { %318 = shalt.err (!%p315_p9)
}
 0x132   :  { %159 = dma.vmem_to_hbm [thread:$0]  %s157_s12, 128, %s402_s3, [#allocation5]  }
 0x133   :  { %323 = dma.done.wait [#allocation5], 128  }
 0x134   :  { %324 = vsyncadd [#allocation5], 4294967168 }
 0x135   :  { %163 = vsyncpa [#allocation4], 1 }
 0x136   :  { %164 = vsyncpa [#allocation7], 1 }
 0x137   :  { %165 = vsyncpa [#allocation5], 1 }

</bundles_post_ra>
